<compile_context>
chip_gen: v7x
topology: tpu7x:2x2x1
jax: 0.10.0
libtpu: 0.0.40
codegen_flags: <defaults>
</compile_context>

<pallas_src>
import jax
import jax.numpy as jnp
from jax.experimental import pallas as pl
from jax.experimental.pallas import tpu as pltpu

LANE = 128
SUBLANE = 8


def _cdiv(a, b):
    return (a + b - 1) // b


def _round_up(a, b):
    return _cdiv(a, b) * b


def gru_kernel(x_ref, wih_ref, whh_ref, bih_ref, bhh_ref, fc_ref, out_ref):
    """Single-layer GRU (hidden=1) over T steps + Linear(1,1) head.

    x_ref   : VMEM (T, R_TILE, 128) f32   batch packed into (sublane, lane)
    wih_ref : SMEM (3,) f32               [W_ir, W_iz, W_in]
    whh_ref : SMEM (3,) f32               [W_hr, W_hz, W_hn]
    bih_ref : SMEM (3,) f32               [b_ir, b_iz, b_in]
    bhh_ref : SMEM (3,) f32               [b_hr, b_hz, b_hn]
    fc_ref  : SMEM (2,) f32               [fc_weight, fc_bias]
    out_ref : VMEM (R_TILE, 128) f32      y = fc_w * h_T + fc_b
    """
    T = x_ref.shape[0]

    w_ir = wih_ref[0]; w_iz = wih_ref[1]; w_in = wih_ref[2]
    w_hr = whh_ref[0]; w_hz = whh_ref[1]; w_hn = whh_ref[2]
    # Input-side biases fold together with the hidden-side r/z biases (they
    # are added before the nonlinearity); b_hn must stay inside r * (...).
    b_r = bih_ref[0] + bhh_ref[0]
    b_z = bih_ref[1] + bhh_ref[1]
    b_in = bih_ref[2]
    b_hn = bhh_ref[2]

    def sigmoid_via_tanh(v):
        # sigmoid(v) == 0.5 * tanh(0.5 * v) + 0.5 : a single EUP push plus two
        # cheap VALU ops instead of exp + reciprocal.
        return 0.5 * jnp.tanh(0.5 * v) + 0.5

    # Fully unrolled recurrence (T = 6 is a small compile-time constant).
    # Gate inputs are computed inline per step — no (T, r_tile, 128)
    # temporaries are materialized in VMEM.
    h = jnp.zeros(out_ref.shape, jnp.float32)
    for t in range(T):
        x_t = x_ref[t]                                  # (r_tile, 128), aligned
        r = sigmoid_via_tanh(w_ir * x_t + b_r + w_hr * h)
        z = sigmoid_via_tanh(w_iz * x_t + b_z + w_hz * h)
        n = jnp.tanh(w_in * x_t + b_in + r * (w_hn * h + b_hn))
        h = n + z * (h - n)                             # == (1-z)*n + z*h

    out_ref[...] = fc_ref[0] * h + fc_ref[1]


def gru_net_pallas_packed(x_trl, w_ih, w_hh, b_ih, b_hh, fc_w, fc_b, *,
                          r_tile=512):
    """Packed entry point: x_trl is (T, R, 128) f32 with the batch already
    laid out as (row=sublane-group, lane).  Returns (R, 128) f32.

    Use this from the federated stacking code to skip the host-side
    transpose/pad repack entirely.  Requires R % r_tile == 0.
    """
    T, R, lane = x_trl.shape
    assert lane == LANE
    assert r_tile % SUBLANE == 0 and R % r_tile == 0, (r_tile, R)

    fc = jnp.stack([jnp.asarray(fc_w).reshape(()),
                    jnp.asarray(fc_b).reshape(())]).astype(jnp.float32)

    # Size the scoped-VMEM limit from the actual tile (double-buffered input +
    # output plus slack); stays well inside v7x's 64 MiB for r_tile <= 1024.
    x_block_bytes = r_tile * T * LANE * 4
    out_block_bytes = r_tile * LANE * 4
    vmem_limit = int(min(100 * 2**20,
                         max(16 * 2**20, 3 * (x_block_bytes + out_block_bytes))))

    return pl.pallas_call(
        gru_kernel,
        out_shape=jax.ShapeDtypeStruct((R, LANE), jnp.float32),
        grid=(R // r_tile,),
        in_specs=[
            pl.BlockSpec((T, r_tile, LANE), lambda i: (0, i, 0)),        # x tile
            pl.BlockSpec(memory_space=pltpu.MemorySpace.SMEM),           # w_ih
            pl.BlockSpec(memory_space=pltpu.MemorySpace.SMEM),           # w_hh
            pl.BlockSpec(memory_space=pltpu.MemorySpace.SMEM),           # b_ih
            pl.BlockSpec(memory_space=pltpu.MemorySpace.SMEM),           # b_hh
            pl.BlockSpec(memory_space=pltpu.MemorySpace.SMEM),           # fc
        ],
        out_specs=pl.BlockSpec((r_tile, LANE), lambda i: (i, 0)),
        compiler_params=pltpu.CompilerParams(
            dimension_semantics=("parallel",),   # megacore-shardable on v7x
            vmem_limit_bytes=vmem_limit,
        ),
    )(x_trl, w_ih.astype(jnp.float32), w_hh.astype(jnp.float32),
      b_ih.astype(jnp.float32), b_hh.astype(jnp.float32), fc)


def gru_net_pallas(x_btk, w_ih, w_hh, b_ih, b_hh, fc_w, fc_b, *, r_tile=512):
    """x_btk: (B, T, 1) float32 (PyTorch batch_first layout). Returns (B, 1).

    r_tile is the number of 128-lane rows per grid step (multiple of 8);
    512 gives ~1.5 MiB input tiles (good for all of v5e/v6e/v7x).  It is
    auto-clamped for small batches, and split so the grid has >=2 steps when
    there is enough work (so both v7x TensorCores are used).
    """
    B, T, K = x_btk.shape
    assert K == 1

    rows = _cdiv(B, LANE)                                   # 128-wide rows needed
    r_tile = max(SUBLANE, (int(r_tile) // SUBLANE) * SUBLANE)
    r_tile = min(r_tile, _round_up(rows, SUBLANE))
    # Keep >= 2 grid steps when there is enough work for two TensorCores.
    if rows > 2 * SUBLANE and _cdiv(rows, r_tile) < 2:
        r_tile = _round_up(_cdiv(rows, 2), SUBLANE)
    R = _round_up(rows, r_tile)
    Bp = R * LANE

    # TODO(synk): this transpose+pad repack rereads/rewrites the whole input in
    # HBM; the federated stacking should build x directly in (T, R, 128) layout
    # and call gru_net_pallas_packed to remove it from the end-to-end path.
    x_tb = jnp.transpose(x_btk[..., 0], (1, 0)).astype(jnp.float32)   # (T, B)
    x_tb = jnp.pad(x_tb, ((0, 0), (0, Bp - B)))
    x_trl = x_tb.reshape(T, R, LANE)

    out = gru_net_pallas_packed(x_trl, w_ih, w_hh, b_ih, b_hh, fc_w, fc_b,
                                r_tile=r_tile)
    # Drop padded lanes before returning.
    return out.reshape(Bp)[:B].reshape(B, 1)


def gru_net_reference(x_btk, w_ih, w_hh, b_ih, b_hh, fc_w, fc_b):
    """Pure-JAX reference mirroring torch.nn.GRU (hidden=1) + Linear(1,1)."""
    B, T, _ = x_btk.shape
    h = jnp.zeros((B, 1), jnp.float32)
    for t in range(T):
        x_t = x_btk[:, t, :]                            # (B, 1)
        r = jax.nn.sigmoid(w_ih[0] * x_t + b_ih[0] + w_hh[0] * h + b_hh[0])
        z = jax.nn.sigmoid(w_ih[1] * x_t + b_ih[1] + w_hh[1] * h + b_hh[1])
        n = jnp.tanh(w_ih[2] * x_t + b_ih[2] + r * (w_hh[2] * h + b_hh[2]))
        h = (1.0 - z) * n + z * h
    return fc_w * h + fc_b                              # (B, 1)


if __name__ == "__main__":
    # Shapes implied by GRUNet(input_size=1, hidden_size=1, seq_len=6,
    # output_size=1, num_layers=1); small synthetic batch.
    T = 6

    key = jax.random.PRNGKey(0)
    kx, k1, k2, k3, k4, k5, k6, kx2 = jax.random.split(key, 8)

    # GRU(input=1, hidden=1): weight_ih_l0 (3,1), weight_hh_l0 (3,1),
    # bias_ih_l0 (3,), bias_hh_l0 (3,); Linear(1,1): weight (1,1), bias (1,).
    # Flattened to (3,) / scalars.
    w_ih = 0.5 * jax.random.normal(k1, (3,), dtype=jnp.float32)
    w_hh = 0.5 * jax.random.normal(k2, (3,), dtype=jnp.float32)
    b_ih = 0.1 * jax.random.normal(k3, (3,), dtype=jnp.float32)
    b_hh = 0.1 * jax.random.normal(k4, (3,), dtype=jnp.float32)
    fc_w = 0.5 * jax.random.normal(k5, (1,), dtype=jnp.float32)
    fc_b = 0.1 * jax.random.normal(k6, (1,), dtype=jnp.float32)

    # TODO(synk): the federated meta-training loop (per-client FOMAML inner
    # updates, parameter averaging, file I/O) is host-side orchestration with
    # no kernel-level equivalent; only the GRUNet forward is implemented here.
    # In practice all clients' sequences should be stacked along the batch
    # axis (ideally directly in (T, R, 128) layout) and fed through a single
    # pallas_call to amortize launch cost.

    # --- Small smoke test (single grid step) ------------------------------
    B = 8
    x = jax.random.normal(kx, (B, T, 1), dtype=jnp.float32)
    y_kernel = jax.block_until_ready(
        gru_net_pallas(x, w_ih, w_hh, b_ih, b_hh, fc_w, fc_b))
    y_ref = gru_net_reference(x, w_ih, w_hh, b_ih, b_hh, fc_w, fc_b)
    assert y_kernel.shape == (B, 1)
    assert jnp.allclose(y_kernel, y_ref, atol=1e-5, rtol=1e-4), (
        f"mismatch: {y_kernel} vs {y_ref}")

    # --- Multi-grid-step test (padding + 3 grid steps, r_tile=8) -----------
    B2 = 2050
    x2 = jax.random.normal(kx2, (B2, T, 1), dtype=jnp.float32)
    y2_kernel = jax.block_until_ready(
        gru_net_pallas(x2, w_ih, w_hh, b_ih, b_hh, fc_w, fc_b, r_tile=8))
    y2_ref = gru_net_reference(x2, w_ih, w_hh, b_ih, b_hh, fc_w, fc_b)
    assert y2_kernel.shape == (B2, 1)
    assert jnp.allclose(y2_kernel, y2_ref, atol=1e-5, rtol=1e-4), "large-batch mismatch"

    print("KERNEL_OK")
</pallas_src>

<mosaic_0001>
module attributes {stable_mosaic.version = 11 : i64} {
  func.func @gru_kernel(%arg0: i32, %arg1: memref<6x8x128xf32, #tpu.memory_space<vmem>>, %arg2: memref<3xf32, #tpu.memory_space<smem>>, %arg3: memref<3xf32, #tpu.memory_space<smem>>, %arg4: memref<3xf32, #tpu.memory_space<smem>>, %arg5: memref<3xf32, #tpu.memory_space<smem>>, %arg6: memref<2xf32, #tpu.memory_space<smem>>, %arg7: memref<8x128xf32, #tpu.memory_space<vmem>>) attributes {dimension_semantics = [#tpu.dimension_semantics<parallel>], iteration_bounds = array<i64: 1>, scalar_prefetch = 0 : i64, scratch_operands = 0 : i64, tpu.core_type = #tpu.core_type<tc>, window_params = [{transform_indices = @transform_0, window_bounds = array<i64: 6, 8, 128>}, {transform_indices = @transform_1, window_bounds = array<i64: 3>}, {transform_indices = @transform_2, window_bounds = array<i64: 3>}, {transform_indices = @transform_3, window_bounds = array<i64: 3>}, {transform_indices = @transform_4, window_bounds = array<i64: 3>}, {transform_indices = @transform_5, window_bounds = array<i64: 2>}, {transform_indices = @transform_6, window_bounds = array<i64: 8, 128>}]} {
    %c0 = arith.constant 0 : index
    %0 = memref.load %arg2[%c0] : memref<3xf32, #tpu.memory_space<smem>>
    %c1 = arith.constant 1 : index
    %1 = memref.load %arg2[%c1] : memref<3xf32, #tpu.memory_space<smem>>
    %c2 = arith.constant 2 : index
    %2 = memref.load %arg2[%c2] : memref<3xf32, #tpu.memory_space<smem>>
    %c0_0 = arith.constant 0 : index
    %3 = memref.load %arg3[%c0_0] : memref<3xf32, #tpu.memory_space<smem>>
    %c1_1 = arith.constant 1 : index
    %4 = memref.load %arg3[%c1_1] : memref<3xf32, #tpu.memory_space<smem>>
    %c2_2 = arith.constant 2 : index
    %5 = memref.load %arg3[%c2_2] : memref<3xf32, #tpu.memory_space<smem>>
    %c0_3 = arith.constant 0 : index
    %6 = memref.load %arg4[%c0_3] : memref<3xf32, #tpu.memory_space<smem>>
    %c0_4 = arith.constant 0 : index
    %7 = memref.load %arg5[%c0_4] : memref<3xf32, #tpu.memory_space<smem>>
    %8 = arith.addf %6, %7 : f32
    %c1_5 = arith.constant 1 : index
    %9 = memref.load %arg4[%c1_5] : memref<3xf32, #tpu.memory_space<smem>>
    %c1_6 = arith.constant 1 : index
    %10 = memref.load %arg5[%c1_6] : memref<3xf32, #tpu.memory_space<smem>>
    %11 = arith.addf %9, %10 : f32
    %c2_7 = arith.constant 2 : index
    %12 = memref.load %arg4[%c2_7] : memref<3xf32, #tpu.memory_space<smem>>
    %c2_8 = arith.constant 2 : index
    %13 = memref.load %arg5[%c2_8] : memref<3xf32, #tpu.memory_space<smem>>
    %cst = arith.constant 0.000000e+00 : f32
    %14 = vector.broadcast %cst : f32 to vector<8x128xf32>
    %c0_9 = arith.constant 0 : index
    %c0_10 = arith.constant 0 : index
    %c0_11 = arith.constant 0 : index
    %15 = vector.load %arg1[%c0_9, %c0_10, %c0_11] : memref<6x8x128xf32, #tpu.memory_space<vmem>>, vector<1x8x128xf32>
    %16 = vector.shape_cast %15 : vector<1x8x128xf32> to vector<8x128xf32>
    %17 = vector.broadcast %0 : f32 to vector<8x128xf32>
    %18 = arith.mulf %17, %16 : vector<8x128xf32>
    %19 = vector.broadcast %8 : f32 to vector<8x128xf32>
    %20 = arith.addf %18, %19 : vector<8x128xf32>
    %21 = vector.broadcast %3 : f32 to vector<8x128xf32>
    %22 = arith.mulf %21, %14 : vector<8x128xf32>
    %23 = arith.addf %20, %22 : vector<8x128xf32>
    %cst_12 = arith.constant 5.000000e-01 : f32
    %24 = vector.broadcast %cst_12 : f32 to vector<8x128xf32>
    %25 = arith.mulf %24, %23 : vector<8x128xf32>
    %26 = math.tanh %25 : vector<8x128xf32>
    %cst_13 = arith.constant 5.000000e-01 : f32
    %27 = vector.broadcast %cst_13 : f32 to vector<8x128xf32>
    %28 = arith.mulf %27, %26 : vector<8x128xf32>
    %cst_14 = arith.constant 5.000000e-01 : f32
    %29 = vector.broadcast %cst_14 : f32 to vector<8x128xf32>
    %30 = arith.addf %28, %29 : vector<8x128xf32>
    %31 = vector.broadcast %1 : f32 to vector<8x128xf32>
    %32 = arith.mulf %31, %16 : vector<8x128xf32>
    %33 = vector.broadcast %11 : f32 to vector<8x128xf32>
    %34 = arith.addf %32, %33 : vector<8x128xf32>
    %35 = vector.broadcast %4 : f32 to vector<8x128xf32>
    %36 = arith.mulf %35, %14 : vector<8x128xf32>
    %37 = arith.addf %34, %36 : vector<8x128xf32>
    %cst_15 = arith.constant 5.000000e-01 : f32
    %38 = vector.broadcast %cst_15 : f32 to vector<8x128xf32>
    %39 = arith.mulf %38, %37 : vector<8x128xf32>
    %40 = math.tanh %39 : vector<8x128xf32>
    %cst_16 = arith.constant 5.000000e-01 : f32
    %41 = vector.broadcast %cst_16 : f32 to vector<8x128xf32>
    %42 = arith.mulf %41, %40 : vector<8x128xf32>
    %cst_17 = arith.constant 5.000000e-01 : f32
    %43 = vector.broadcast %cst_17 : f32 to vector<8x128xf32>
    %44 = arith.addf %42, %43 : vector<8x128xf32>
    %45 = vector.broadcast %2 : f32 to vector<8x128xf32>
    %46 = arith.mulf %45, %16 : vector<8x128xf32>
    %47 = vector.broadcast %12 : f32 to vector<8x128xf32>
    %48 = arith.addf %46, %47 : vector<8x128xf32>
    %49 = vector.broadcast %5 : f32 to vector<8x128xf32>
    %50 = arith.mulf %49, %14 : vector<8x128xf32>
    %51 = vector.broadcast %13 : f32 to vector<8x128xf32>
    %52 = arith.addf %50, %51 : vector<8x128xf32>
    %53 = arith.mulf %30, %52 : vector<8x128xf32>
    %54 = arith.addf %48, %53 : vector<8x128xf32>
    %55 = math.tanh %54 : vector<8x128xf32>
    %56 = arith.subf %14, %55 : vector<8x128xf32>
    %57 = arith.mulf %44, %56 : vector<8x128xf32>
    %58 = arith.addf %55, %57 : vector<8x128xf32>
    %c1_18 = arith.constant 1 : index
    %c0_19 = arith.constant 0 : index
    %c0_20 = arith.constant 0 : index
    %59 = vector.load %arg1[%c1_18, %c0_19, %c0_20] : memref<6x8x128xf32, #tpu.memory_space<vmem>>, vector<1x8x128xf32>
    %60 = vector.shape_cast %59 : vector<1x8x128xf32> to vector<8x128xf32>
    %61 = vector.broadcast %0 : f32 to vector<8x128xf32>
    %62 = arith.mulf %61, %60 : vector<8x128xf32>
    %63 = vector.broadcast %8 : f32 to vector<8x128xf32>
    %64 = arith.addf %62, %63 : vector<8x128xf32>
    %65 = vector.broadcast %3 : f32 to vector<8x128xf32>
    %66 = arith.mulf %65, %58 : vector<8x128xf32>
    %67 = arith.addf %64, %66 : vector<8x128xf32>
    %cst_21 = arith.constant 5.000000e-01 : f32
    %68 = vector.broadcast %cst_21 : f32 to vector<8x128xf32>
    %69 = arith.mulf %68, %67 : vector<8x128xf32>
    %70 = math.tanh %69 : vector<8x128xf32>
    %cst_22 = arith.constant 5.000000e-01 : f32
    %71 = vector.broadcast %cst_22 : f32 to vector<8x128xf32>
    %72 = arith.mulf %71, %70 : vector<8x128xf32>
    %cst_23 = arith.constant 5.000000e-01 : f32
    %73 = vector.broadcast %cst_23 : f32 to vector<8x128xf32>
    %74 = arith.addf %72, %73 : vector<8x128xf32>
    %75 = vector.broadcast %1 : f32 to vector<8x128xf32>
    %76 = arith.mulf %75, %60 : vector<8x128xf32>
    %77 = vector.broadcast %11 : f32 to vector<8x128xf32>
    %78 = arith.addf %76, %77 : vector<8x128xf32>
    %79 = vector.broadcast %4 : f32 to vector<8x128xf32>
    %80 = arith.mulf %79, %58 : vector<8x128xf32>
    %81 = arith.addf %78, %80 : vector<8x128xf32>
    %cst_24 = arith.constant 5.000000e-01 : f32
    %82 = vector.broadcast %cst_24 : f32 to vector<8x128xf32>
    %83 = arith.mulf %82, %81 : vector<8x128xf32>
    %84 = math.tanh %83 : vector<8x128xf32>
    %cst_25 = arith.constant 5.000000e-01 : f32
    %85 = vector.broadcast %cst_25 : f32 to vector<8x128xf32>
    %86 = arith.mulf %85, %84 : vector<8x128xf32>
    %cst_26 = arith.constant 5.000000e-01 : f32
    %87 = vector.broadcast %cst_26 : f32 to vector<8x128xf32>
    %88 = arith.addf %86, %87 : vector<8x128xf32>
    %89 = vector.broadcast %2 : f32 to vector<8x128xf32>
    %90 = arith.mulf %89, %60 : vector<8x128xf32>
    %91 = vector.broadcast %12 : f32 to vector<8x128xf32>
    %92 = arith.addf %90, %91 : vector<8x128xf32>
    %93 = vector.broadcast %5 : f32 to vector<8x128xf32>
    %94 = arith.mulf %93, %58 : vector<8x128xf32>
    %95 = vector.broadcast %13 : f32 to vector<8x128xf32>
    %96 = arith.addf %94, %95 : vector<8x128xf32>
    %97 = arith.mulf %74, %96 : vector<8x128xf32>
    %98 = arith.addf %92, %97 : vector<8x128xf32>
    %99 = math.tanh %98 : vector<8x128xf32>
    %100 = arith.subf %58, %99 : vector<8x128xf32>
    %101 = arith.mulf %88, %100 : vector<8x128xf32>
    %102 = arith.addf %99, %101 : vector<8x128xf32>
    %c2_27 = arith.constant 2 : index
    %c0_28 = arith.constant 0 : index
    %c0_29 = arith.constant 0 : index
    %103 = vector.load %arg1[%c2_27, %c0_28, %c0_29] : memref<6x8x128xf32, #tpu.memory_space<vmem>>, vector<1x8x128xf32>
    %104 = vector.shape_cast %103 : vector<1x8x128xf32> to vector<8x128xf32>
    %105 = vector.broadcast %0 : f32 to vector<8x128xf32>
    %106 = arith.mulf %105, %104 : vector<8x128xf32>
    %107 = vector.broadcast %8 : f32 to vector<8x128xf32>
    %108 = arith.addf %106, %107 : vector<8x128xf32>
    %109 = vector.broadcast %3 : f32 to vector<8x128xf32>
    %110 = arith.mulf %109, %102 : vector<8x128xf32>
    %111 = arith.addf %108, %110 : vector<8x128xf32>
    %cst_30 = arith.constant 5.000000e-01 : f32
    %112 = vector.broadcast %cst_30 : f32 to vector<8x128xf32>
    %113 = arith.mulf %112, %111 : vector<8x128xf32>
    %114 = math.tanh %113 : vector<8x128xf32>
    %cst_31 = arith.constant 5.000000e-01 : f32
    %115 = vector.broadcast %cst_31 : f32 to vector<8x128xf32>
    %116 = arith.mulf %115, %114 : vector<8x128xf32>
    %cst_32 = arith.constant 5.000000e-01 : f32
    %117 = vector.broadcast %cst_32 : f32 to vector<8x128xf32>
    %118 = arith.addf %116, %117 : vector<8x128xf32>
    %119 = vector.broadcast %1 : f32 to vector<8x128xf32>
    %120 = arith.mulf %119, %104 : vector<8x128xf32>
    %121 = vector.broadcast %11 : f32 to vector<8x128xf32>
    %122 = arith.addf %120, %121 : vector<8x128xf32>
    %123 = vector.broadcast %4 : f32 to vector<8x128xf32>
    %124 = arith.mulf %123, %102 : vector<8x128xf32>
    %125 = arith.addf %122, %124 : vector<8x128xf32>
    %cst_33 = arith.constant 5.000000e-01 : f32
    %126 = vector.broadcast %cst_33 : f32 to vector<8x128xf32>
    %127 = arith.mulf %126, %125 : vector<8x128xf32>
    %128 = math.tanh %127 : vector<8x128xf32>
    %cst_34 = arith.constant 5.000000e-01 : f32
    %129 = vector.broadcast %cst_34 : f32 to vector<8x128xf32>
    %130 = arith.mulf %129, %128 : vector<8x128xf32>
    %cst_35 = arith.constant 5.000000e-01 : f32
    %131 = vector.broadcast %cst_35 : f32 to vector<8x128xf32>
    %132 = arith.addf %130, %131 : vector<8x128xf32>
    %133 = vector.broadcast %2 : f32 to vector<8x128xf32>
    %134 = arith.mulf %133, %104 : vector<8x128xf32>
    %135 = vector.broadcast %12 : f32 to vector<8x128xf32>
    %136 = arith.addf %134, %135 : vector<8x128xf32>
    %137 = vector.broadcast %5 : f32 to vector<8x128xf32>
    %138 = arith.mulf %137, %102 : vector<8x128xf32>
    %139 = vector.broadcast %13 : f32 to vector<8x128xf32>
    %140 = arith.addf %138, %139 : vector<8x128xf32>
    %141 = arith.mulf %118, %140 : vector<8x128xf32>
    %142 = arith.addf %136, %141 : vector<8x128xf32>
    %143 = math.tanh %142 : vector<8x128xf32>
    %144 = arith.subf %102, %143 : vector<8x128xf32>
    %145 = arith.mulf %132, %144 : vector<8x128xf32>
    %146 = arith.addf %143, %145 : vector<8x128xf32>
    %c3 = arith.constant 3 : index
    %c0_36 = arith.constant 0 : index
    %c0_37 = arith.constant 0 : index
    %147 = vector.load %arg1[%c3, %c0_36, %c0_37] : memref<6x8x128xf32, #tpu.memory_space<vmem>>, vector<1x8x128xf32>
    %148 = vector.shape_cast %147 : vector<1x8x128xf32> to vector<8x128xf32>
    %149 = vector.broadcast %0 : f32 to vector<8x128xf32>
    %150 = arith.mulf %149, %148 : vector<8x128xf32>
    %151 = vector.broadcast %8 : f32 to vector<8x128xf32>
    %152 = arith.addf %150, %151 : vector<8x128xf32>
    %153 = vector.broadcast %3 : f32 to vector<8x128xf32>
    %154 = arith.mulf %153, %146 : vector<8x128xf32>
    %155 = arith.addf %152, %154 : vector<8x128xf32>
    %cst_38 = arith.constant 5.000000e-01 : f32
    %156 = vector.broadcast %cst_38 : f32 to vector<8x128xf32>
    %157 = arith.mulf %156, %155 : vector<8x128xf32>
    %158 = math.tanh %157 : vector<8x128xf32>
    %cst_39 = arith.constant 5.000000e-01 : f32
    %159 = vector.broadcast %cst_39 : f32 to vector<8x128xf32>
    %160 = arith.mulf %159, %158 : vector<8x128xf32>
    %cst_40 = arith.constant 5.000000e-01 : f32
    %161 = vector.broadcast %cst_40 : f32 to vector<8x128xf32>
    %162 = arith.addf %160, %161 : vector<8x128xf32>
    %163 = vector.broadcast %1 : f32 to vector<8x128xf32>
    %164 = arith.mulf %163, %148 : vector<8x128xf32>
    %165 = vector.broadcast %11 : f32 to vector<8x128xf32>
    %166 = arith.addf %164, %165 : vector<8x128xf32>
    %167 = vector.broadcast %4 : f32 to vector<8x128xf32>
    %168 = arith.mulf %167, %146 : vector<8x128xf32>
    %169 = arith.addf %166, %168 : vector<8x128xf32>
    %cst_41 = arith.constant 5.000000e-01 : f32
    %170 = vector.broadcast %cst_41 : f32 to vector<8x128xf32>
    %171 = arith.mulf %170, %169 : vector<8x128xf32>
    %172 = math.tanh %171 : vector<8x128xf32>
    %cst_42 = arith.constant 5.000000e-01 : f32
    %173 = vector.broadcast %cst_42 : f32 to vector<8x128xf32>
    %174 = arith.mulf %173, %172 : vector<8x128xf32>
    %cst_43 = arith.constant 5.000000e-01 : f32
    %175 = vector.broadcast %cst_43 : f32 to vector<8x128xf32>
    %176 = arith.addf %174, %175 : vector<8x128xf32>
    %177 = vector.broadcast %2 : f32 to vector<8x128xf32>
    %178 = arith.mulf %177, %148 : vector<8x128xf32>
    %179 = vector.broadcast %12 : f32 to vector<8x128xf32>
    %180 = arith.addf %178, %179 : vector<8x128xf32>
    %181 = vector.broadcast %5 : f32 to vector<8x128xf32>
    %182 = arith.mulf %181, %146 : vector<8x128xf32>
    %183 = vector.broadcast %13 : f32 to vector<8x128xf32>
    %184 = arith.addf %182, %183 : vector<8x128xf32>
    %185 = arith.mulf %162, %184 : vector<8x128xf32>
    %186 = arith.addf %180, %185 : vector<8x128xf32>
    %187 = math.tanh %186 : vector<8x128xf32>
    %188 = arith.subf %146, %187 : vector<8x128xf32>
    %189 = arith.mulf %176, %188 : vector<8x128xf32>
    %190 = arith.addf %187, %189 : vector<8x128xf32>
    %c4 = arith.constant 4 : index
    %c0_44 = arith.constant 0 : index
    %c0_45 = arith.constant 0 : index
    %191 = vector.load %arg1[%c4, %c0_44, %c0_45] : memref<6x8x128xf32, #tpu.memory_space<vmem>>, vector<1x8x128xf32>
    %192 = vector.shape_cast %191 : vector<1x8x128xf32> to vector<8x128xf32>
    %193 = vector.broadcast %0 : f32 to vector<8x128xf32>
    %194 = arith.mulf %193, %192 : vector<8x128xf32>
    %195 = vector.broadcast %8 : f32 to vector<8x128xf32>
    %196 = arith.addf %194, %195 : vector<8x128xf32>
    %197 = vector.broadcast %3 : f32 to vector<8x128xf32>
    %198 = arith.mulf %197, %190 : vector<8x128xf32>
    %199 = arith.addf %196, %198 : vector<8x128xf32>
    %cst_46 = arith.constant 5.000000e-01 : f32
    %200 = vector.broadcast %cst_46 : f32 to vector<8x128xf32>
    %201 = arith.mulf %200, %199 : vector<8x128xf32>
    %202 = math.tanh %201 : vector<8x128xf32>
    %cst_47 = arith.constant 5.000000e-01 : f32
    %203 = vector.broadcast %cst_47 : f32 to vector<8x128xf32>
    %204 = arith.mulf %203, %202 : vector<8x128xf32>
    %cst_48 = arith.constant 5.000000e-01 : f32
    %205 = vector.broadcast %cst_48 : f32 to vector<8x128xf32>
    %206 = arith.addf %204, %205 : vector<8x128xf32>
    %207 = vector.broadcast %1 : f32 to vector<8x128xf32>
    %208 = arith.mulf %207, %192 : vector<8x128xf32>
    %209 = vector.broadcast %11 : f32 to vector<8x128xf32>
    %210 = arith.addf %208, %209 : vector<8x128xf32>
    %211 = vector.broadcast %4 : f32 to vector<8x128xf32>
    %212 = arith.mulf %211, %190 : vector<8x128xf32>
    %213 = arith.addf %210, %212 : vector<8x128xf32>
    %cst_49 = arith.constant 5.000000e-01 : f32
    %214 = vector.broadcast %cst_49 : f32 to vector<8x128xf32>
    %215 = arith.mulf %214, %213 : vector<8x128xf32>
    %216 = math.tanh %215 : vector<8x128xf32>
    %cst_50 = arith.constant 5.000000e-01 : f32
    %217 = vector.broadcast %cst_50 : f32 to vector<8x128xf32>
    %218 = arith.mulf %217, %216 : vector<8x128xf32>
    %cst_51 = arith.constant 5.000000e-01 : f32
    %219 = vector.broadcast %cst_51 : f32 to vector<8x128xf32>
    %220 = arith.addf %218, %219 : vector<8x128xf32>
    %221 = vector.broadcast %2 : f32 to vector<8x128xf32>
    %222 = arith.mulf %221, %192 : vector<8x128xf32>
    %223 = vector.broadcast %12 : f32 to vector<8x128xf32>
    %224 = arith.addf %222, %223 : vector<8x128xf32>
    %225 = vector.broadcast %5 : f32 to vector<8x128xf32>
    %226 = arith.mulf %225, %190 : vector<8x128xf32>
    %227 = vector.broadcast %13 : f32 to vector<8x128xf32>
    %228 = arith.addf %226, %227 : vector<8x128xf32>
    %229 = arith.mulf %206, %228 : vector<8x128xf32>
    %230 = arith.addf %224, %229 : vector<8x128xf32>
    %231 = math.tanh %230 : vector<8x128xf32>
    %232 = arith.subf %190, %231 : vector<8x128xf32>
    %233 = arith.mulf %220, %232 : vector<8x128xf32>
    %234 = arith.addf %231, %233 : vector<8x128xf32>
    %c5 = arith.constant 5 : index
    %c0_52 = arith.constant 0 : index
    %c0_53 = arith.constant 0 : index
    %235 = vector.load %arg1[%c5, %c0_52, %c0_53] : memref<6x8x128xf32, #tpu.memory_space<vmem>>, vector<1x8x128xf32>
    %236 = vector.shape_cast %235 : vector<1x8x128xf32> to vector<8x128xf32>
    %237 = vector.broadcast %0 : f32 to vector<8x128xf32>
    %238 = arith.mulf %237, %236 : vector<8x128xf32>
    %239 = vector.broadcast %8 : f32 to vector<8x128xf32>
    %240 = arith.addf %238, %239 : vector<8x128xf32>
    %241 = vector.broadcast %3 : f32 to vector<8x128xf32>
    %242 = arith.mulf %241, %234 : vector<8x128xf32>
    %243 = arith.addf %240, %242 : vector<8x128xf32>
    %cst_54 = arith.constant 5.000000e-01 : f32
    %244 = vector.broadcast %cst_54 : f32 to vector<8x128xf32>
    %245 = arith.mulf %244, %243 : vector<8x128xf32>
    %246 = math.tanh %245 : vector<8x128xf32>
    %cst_55 = arith.constant 5.000000e-01 : f32
    %247 = vector.broadcast %cst_55 : f32 to vector<8x128xf32>
    %248 = arith.mulf %247, %246 : vector<8x128xf32>
    %cst_56 = arith.constant 5.000000e-01 : f32
    %249 = vector.broadcast %cst_56 : f32 to vector<8x128xf32>
    %250 = arith.addf %248, %249 : vector<8x128xf32>
    %251 = vector.broadcast %1 : f32 to vector<8x128xf32>
    %252 = arith.mulf %251, %236 : vector<8x128xf32>
    %253 = vector.broadcast %11 : f32 to vector<8x128xf32>
    %254 = arith.addf %252, %253 : vector<8x128xf32>
    %255 = vector.broadcast %4 : f32 to vector<8x128xf32>
    %256 = arith.mulf %255, %234 : vector<8x128xf32>
    %257 = arith.addf %254, %256 : vector<8x128xf32>
    %cst_57 = arith.constant 5.000000e-01 : f32
    %258 = vector.broadcast %cst_57 : f32 to vector<8x128xf32>
    %259 = arith.mulf %258, %257 : vector<8x128xf32>
    %260 = math.tanh %259 : vector<8x128xf32>
    %cst_58 = arith.constant 5.000000e-01 : f32
    %261 = vector.broadcast %cst_58 : f32 to vector<8x128xf32>
    %262 = arith.mulf %261, %260 : vector<8x128xf32>
    %cst_59 = arith.constant 5.000000e-01 : f32
    %263 = vector.broadcast %cst_59 : f32 to vector<8x128xf32>
    %264 = arith.addf %262, %263 : vector<8x128xf32>
    %265 = vector.broadcast %2 : f32 to vector<8x128xf32>
    %266 = arith.mulf %265, %236 : vector<8x128xf32>
    %267 = vector.broadcast %12 : f32 to vector<8x128xf32>
    %268 = arith.addf %266, %267 : vector<8x128xf32>
    %269 = vector.broadcast %5 : f32 to vector<8x128xf32>
    %270 = arith.mulf %269, %234 : vector<8x128xf32>
    %271 = vector.broadcast %13 : f32 to vector<8x128xf32>
    %272 = arith.addf %270, %271 : vector<8x128xf32>
    %273 = arith.mulf %250, %272 : vector<8x128xf32>
    %274 = arith.addf %268, %273 : vector<8x128xf32>
    %275 = math.tanh %274 : vector<8x128xf32>
    %276 = arith.subf %234, %275 : vector<8x128xf32>
    %277 = arith.mulf %264, %276 : vector<8x128xf32>
    %278 = arith.addf %275, %277 : vector<8x128xf32>
    %c0_60 = arith.constant 0 : index
    %279 = memref.load %arg6[%c0_60] : memref<2xf32, #tpu.memory_space<smem>>
    %280 = vector.broadcast %279 : f32 to vector<8x128xf32>
    %281 = arith.mulf %280, %278 : vector<8x128xf32>
    %c1_61 = arith.constant 1 : index
    %282 = memref.load %arg6[%c1_61] : memref<2xf32, #tpu.memory_space<smem>>
    %283 = vector.broadcast %282 : f32 to vector<8x128xf32>
    %284 = arith.addf %281, %283 : vector<8x128xf32>
    %c0_62 = arith.constant 0 : index
    %c0_63 = arith.constant 0 : index
    %285 = vector.load %arg7[%c0_62, %c0_63] : memref<8x128xf32, #tpu.memory_space<vmem>>, vector<8x128xf32>
    tpu.vector_store %arg7[%c0_62, %c0_63], %284 {strides = array<i32>} : memref<8x128xf32, #tpu.memory_space<vmem>>, vector<8x128xf32>,
    return
  }
  func.func @transform_0(%arg0: i32) -> (i32, i32, i32) {
    %c0_i32 = arith.constant 0 : i32
    %c0_i32_0 = arith.constant 0 : i32
    %c0_i32_1 = arith.constant 0 : i32
    return %c0_i32, %arg0, %c0_i32_0 : i32, i32, i32
  }
  func.func @transform_1(%arg0: i32) -> i32 {
    %c0_i32 = arith.constant 0 : i32
    %c0_i32_0 = arith.constant 0 : i32
    return %c0_i32 : i32
  }
  func.func @transform_2(%arg0: i32) -> i32 {
    %c0_i32 = arith.constant 0 : i32
    %c0_i32_0 = arith.constant 0 : i32
    return %c0_i32 : i32
  }
  func.func @transform_3(%arg0: i32) -> i32 {
    %c0_i32 = arith.constant 0 : i32
    %c0_i32_0 = arith.constant 0 : i32
    return %c0_i32 : i32
  }
  func.func @transform_4(%arg0: i32) -> i32 {
    %c0_i32 = arith.constant 0 : i32
    %c0_i32_0 = arith.constant 0 : i32
    return %c0_i32 : i32
  }
  func.func @transform_5(%arg0: i32) -> i32 {
    %c0_i32 = arith.constant 0 : i32
    %c0_i32_0 = arith.constant 0 : i32
    return %c0_i32 : i32
  }
  func.func @transform_6(%arg0: i32) -> (i32, i32) {
    %c0_i32 = arith.constant 0 : i32
    %c0_i32_0 = arith.constant 0 : i32
    return %arg0, %c0_i32 : i32, i32
  }
}

</mosaic_0001>

<bundles_post_ra>
// kernel: tpu_custom_call.1
= control target key start
LH: loop header
LB: loop body
LE: loop exit
PB: predicated region body
PF: predicated region fallthrough
CT: control target
= control target key end

     0   :  { %11 = vsyncpa [#allocation3], 0  ;;  %s644_s0 = inlined_call_operand.hbm [shape: f32[6,8,128], index: 0, kind: input, shape index: {}]   ;;  %s645_s1 = inlined_call_operand.vmem [shape: f32[3], index: 1, kind: input, shape index: {}]   ;;  %s646_s2 = inlined_call_operand.vmem [shape: f32[3], index: 2, kind: input, shape index: {}]   ;;  %s647_s3 = inlined_call_operand.vmem [shape: f32[3], index: 3, kind: input, shape index: {}]   ;;  %s648_s4 = inlined_call_operand.vmem [shape: f32[3], index: 4, kind: input, shape index: {}]   ;;  %s649_s5 = inlined_call_operand.vmem [shape: f32[2], index: 5, kind: input, shape index: {}]   ;;  %s650_s6 = inlined_call_operand.hbm [shape: f32[8,128], index: 6, kind: output, shape index: {}]  }
   0x1   :  { %12 = vsyncpa [#allocation5], 0 }
   0x2   :  { %13 = vsyncpa [#allocation8], 0 }
   0x3   :  { %14 = vsyncpa [#allocation11], 0  ;;  %s44_s23 = sshll.u32 %s646_s2, 4  ;;  %s45_s23 = int_to_ptr.vmem [resolvable:$true] %s44_s23 }
   0x4   :  { %15 = vsyncpa [#allocation4], 0  ;;  %s64_s26 = sshll.u32 %s648_s4, 4  ;;  %s367_s27 = scalar_lea.vmem %s45_s23, 16  ;;  %s65_s26 = int_to_ptr.vmem [resolvable:$true] %s64_s26 }
   0x5   :  { %p368_p0 = scmp.ne.s32.totalorder %s45_s23, %s367_s27  ;;  %p372_p1 = scmp.lt.s32.totalorder %s45_s23, %s45_s23 }
   0x6   :  { %p373_p2 = scmp.lt.s32.totalorder %s367_s27, %s367_s27 }
   0x8   :  { %p374_p3 = por %p373_p2, %p372_p1 }
   0xa   :  { %p375_p4 = pnand %p374_p3, %p368_p0 }
   0xc   :  { %378 = shalt.err (!%p375_p4)
}
   0xd   :  { %s481_s28 = smov [#allocation7]   ;;  %s379_s29 = scalar_lea.vmem %s65_s26, 16 }
   0xe   :  { %47 = dma.vmem_to_smem %s45_s23, 16, %s481_s28, [#allocation8]  }
   0xf   :  { %p380_p5 = scmp.ne.s32.totalorder %s65_s26, %s379_s29  ;;  %p384_p6 = scmp.lt.s32.totalorder %s65_s26, %s65_s26 }
  0x10   :  { %p385_p7 = scmp.lt.s32.totalorder %s379_s29, %s379_s29 }
  0x12   :  { %p386_p8 = por %p385_p7, %p384_p6 }
  0x14   :  { %p387_p9 = pnand %p386_p8, %p380_p5 }
  0x16   :  { %390 = shalt.err (!%p387_p9)
}
  0x17   :  { %s482_s2 = smov [#allocation10]   ;;  %s483_s4 = smov [#allocation2]  }
  0x18   :  { %67 = dma.vmem_to_smem %s65_s26, 16, %s482_s2, [#allocation11]  }
  0x19   :  { %s21_s30 = sshll.u32 %s483_s4, 4  ;;  %s34_s9 = sshll.u32 %s645_s1, 4  ;;  %s22_s30 = int_to_ptr.vmem [resolvable:$true] %s21_s30  ;;  %s35_s9 = int_to_ptr.vmem [resolvable:$true] %s34_s9 }
  0x1a   :  { %s391_s12 = scalar_lea.hbm %s644_s0, 768 }
  0x1b   :  { %p392_p10 = scmp.ne.s32.totalorder %s644_s0, %s391_s12  ;;  %p395_p11 = scmp.lt.u32.totalorder %s391_s12, %s644_s0 }
  0x1d   :  { %p397_p12 = pnand %p395_p11, %p392_p10 }
  0x1f   :  { %400 = shalt.err (!%p397_p12)
}
  0x20   :  { %s401_s17 = scalar_lea.vmem %s22_s30, 768  ;;  %p406_p0 = scmp.lt.s32.totalorder %s22_s30, %s22_s30 }
  0x21   :  { %p402_p13 = scmp.ne.s32.totalorder %s22_s30, %s401_s17  ;;  %p407_p1 = scmp.lt.s32.totalorder %s401_s17, %s401_s17 }
  0x23   :  { %p408_p2 = por %p407_p1, %p406_p0 }
  0x25   :  { %p409_p3 = pnand %p408_p2, %p402_p13 }
  0x27   :  { %412 = shalt.err (!%p409_p3)
}
  0x28   :  { %s484_s1 = smov 128   ;;  %s485_s18 = smov 8  }
  0x29   :  { %27 = dma.hbm_to_vmem [thread:$0]  %s644_s0, 768, %s22_s30, [#allocation3], %s484_s1, %s484_s1, %s485_s18  }
  0x2a   :  { %s413_s21 = scalar_lea.vmem %s35_s9, 16  ;;  %p418_p5 = scmp.lt.s32.totalorder %s35_s9, %s35_s9 }
  0x2b   :  { %p414_p4 = scmp.ne.s32.totalorder %s35_s9, %s413_s21  ;;  %p419_p6 = scmp.lt.s32.totalorder %s413_s21, %s413_s21 }
  0x2d   :  { %p420_p7 = por %p419_p6, %p418_p5 }
  0x2f   :  { %p421_p8 = pnand %p420_p7, %p414_p4 }
  0x31   :  { %424 = shalt.err (!%p421_p8)
}
  0x32   :  { %s486_s22 = smov [#allocation6]   ;;  %s54_s25 = sshll.u32 %s647_s3, 4  ;;  %s55_s25 = int_to_ptr.vmem [resolvable:$true] %s54_s25 }
  0x33   :  { %37 = dma.vmem_to_smem %s35_s9, 16, %s486_s22, [#allocation5]  }
  0x34   :  { %s74_s28 = sshll.u32 %s649_s5, 4  ;;  %s425_s0 = scalar_lea.vmem %s55_s25, 16  ;;  %s75_s28 = int_to_ptr.vmem [resolvable:$true] %s74_s28 }
  0x35   :  { %p426_p9 = scmp.ne.s32.totalorder %s55_s25, %s425_s0  ;;  %p430_p10 = scmp.lt.s32.totalorder %s55_s25, %s55_s25 }
  0x36   :  { %p431_p11 = scmp.lt.s32.totalorder %s425_s0, %s425_s0 }
  0x38   :  { %p432_p12 = por %p431_p11, %p430_p10 }
  0x3a   :  { %p433_p13 = pnand %p432_p12, %p426_p9 }
  0x3c   :  { %436 = shalt.err (!%p433_p13)
}
  0x3d   :  { %s487_s29 = smov [#allocation9]   ;;  %s437_s2 = scalar_lea.vmem %s75_s28, 16 }
  0x3e   :  { %57 = dma.vmem_to_smem %s55_s25, 16, %s487_s29, [#allocation8]  }
  0x3f   :  { %p438_p0 = scmp.ne.s32.totalorder %s75_s28, %s437_s2  ;;  %p442_p1 = scmp.lt.s32.totalorder %s75_s28, %s75_s28 }
  0x40   :  { %p443_p2 = scmp.lt.s32.totalorder %s437_s2, %s437_s2 }
  0x42   :  { %p444_p3 = por %p443_p2, %p442_p1 }
  0x44   :  { %p445_p4 = pnand %p444_p3, %p438_p0 }
  0x46   :  { %448 = shalt.err (!%p445_p4)
}
  0x47   :  { %s488_s3 = smov [#allocation12]  }
  0x48   :  { %77 = dma.vmem_to_smem %s75_s28, 16, %s488_s3, [#allocation11]  }
  0x49   :  { %471 = dma.done.wait [#allocation3], 768  }
  0x4a   :  { %472 = vsyncadd [#allocation3], 4294966528 }
  0x4b   :  { %473 = dma.done.wait [#allocation5], 16  }
  0x4c   :  { %474 = vsyncadd [#allocation5], 4294967280 }
  0x4d   :  { %475 = dma.done.wait [#allocation8], 32  }
  0x4e   :  { %476 = vsyncadd [#allocation8], 4294967264 }
  0x4f   :  { %477 = dma.done.wait [#allocation11], 32  }
  0x50   :  { %478 = vsyncadd [#allocation11], 4294967264 }
  0x51   :  { %96 = sfence }
  0x52   :  { %s97_s5 = sld [smem:[#allocation6]]  ;;  %s313_s30 = sld [smem:[#allocation6 + $0x1]]  ;;  %v111_v0 = vld [vmem:[#allocation2] sm:$0xff]  ;;  %v149_v32 = vld [vmem:[#allocation2 + $0x8] sm:$0xff]  ;;  %v177_v59 = vld [vmem:[#allocation2 + $0x10] sm:$0xff] }
  0x53   :  { %s100_s4 = sld [smem:[#allocation7]]  ;;  %s317_s9 = sld [smem:[#allocation9 + $0x1]] }
  0x54   :  { %s103_s7 = sld [smem:[#allocation9]]  ;;  %s318_s10 = sld [smem:[#allocation10 + $0x1]] }
  0x55   :  { %s104_s8 = sld [smem:[#allocation10]]  ;;  %s315_s11 = sld [smem:[#allocation7 + $0x1]] }
  0x56   :  { %s316_s14 = sld [smem:[#allocation7 + $0x2]]  ;;  %s288_s1 = sld [smem:[#allocation12]] }
  0x57   :  { %s314_s15 = sld [smem:[#allocation6 + $0x2]]  ;;  %s321_s18 = sld [smem:[#allocation12 + $0x1]] }
  0x58   :  { %v552_v1 = vstv %s97_s5  ;;  %v558_v5 = vstv %s313_s30  ;;  %s320_s16 = sld [smem:[#allocation10 + $0x2]]  ;;  %s489_s19 = smov [#allocation13]  }
  0x59   :  { %v554_v2 = vstv %s100_s4  ;;  %v113_v3 = vmul.f32 %v552_v1, %v111_v0  ;;  %v124_v8 = vmul.f32 %v558_v5, %v111_v0  ;;  %s319_s17 = sld [smem:[#allocation9 + $0x2]]  ;;  %v150_v36 = vmul.f32 %v149_v32, %v552_v1  ;;  %s301_s20 = sshll.u32 %s489_s19, 4  ;;  %s302_s20 = int_to_ptr.vmem [resolvable:$true] %s301_s20 }
  0x5a   :  { %s108_s13 = sadd.f32 %s318_s10, %s317_s9  ;;  %v117_v4 = vmul.f32 0.0, %v554_v2  ;;  %v158_v41 = vmul.f32 %v149_v32, %v558_v5  ;;  %v178_v63 = vmul.f32 %v177_v59, %v552_v1  ;;  %s449_s21 = scalar_lea.vmem %s302_s20, 128 }
  0x5b   :  { %s105_s12 = sadd.f32 %s104_s8, %s103_s7  ;;  %v566_v11 = vstv %s315_s11  ;;  %p450_p5 = scmp.ne.s32.totalorder %s302_s20, %s449_s21 }
  0x5c   :  { %v564_v10 = vstv %s108_s13  ;;  %v128_v14 = vmul.f32 0.0, %v566_v11  ;;  %v570_v16 = vstv %s316_s14  ;;  %p454_p6 = scmp.lt.s32.totalorder %s302_s20, %s302_s20  ;;  %p455_p7 = scmp.lt.s32.totalorder %s449_s21, %s449_s21 }
  0x5d   :  { %v560_v6 = vstv %s105_s12  ;;  %v126_v13 = vadd.f32 %v564_v10, %v124_v8  ;;  %v572_v17 = vstv %s314_s15  ;;  %v139_v19 = vmul.f32 0.0, %v570_v16 }
  0x5e   :  { %v115_v7 = vadd.f32 %v560_v6, %v113_v3  ;;  %v575_v20 = vstv %s320_s16  ;;  %v135_v21 = vmul.f32 %v572_v17, %v111_v0  ;;  %v151_v39 = vadd.f32 %v150_v36, %v560_v6  ;;  %p456_p8 = por %p455_p7, %p454_p6 }
  0x5f   :  { %v129_v15 = vadd.f32 %v128_v14, %v126_v13  ;;  %v578_v23 = vstv %s319_s17  ;;  %v141_v25 = vadd.f32 %v575_v20, %v139_v19  ;;  %v159_v44 = vadd.f32 %v158_v41, %v564_v10 }
  0x60   :  { %v118_v9 = vadd.f32 %v117_v4, %v115_v7  ;;  %v137_v27 = vadd.f32 %v578_v23, %v135_v21  ;;  %v166_v49 = vmul.f32 %v149_v32, %v572_v17  ;;  %v179_v4 = vadd.f32 %v178_v63, %v560_v6  ;;  %v205_v32 = vld [vmem:[#allocation2 + $0x18] sm:$0xff]  ;;  %p457_p9 = pnand %p456_p8, %p450_p5 }
  0x61   :  { %v130_v18 = vmul.f32 0.5, %v129_v15  ;;  %v186_v8 = vmul.f32 %v177_v59, %v558_v5  ;;  %v194_v21 = vmul.f32 %v177_v59, %v572_v17  ;;  %v206_v36 = vmul.f32 %v205_v32, %v552_v1  ;;  %v233_v59 = vld [vmem:[#allocation2 + $0x20] sm:$0xff] }
  0x62   :  { %v119_v12 = vmul.f32 0.5, %v118_v9  ;;  %v167_v54 = vadd.f32 %v166_v49, %v578_v23  ;;  %v214_v41 = vmul.f32 %v205_v32, %v558_v5  ;;  %v222_v49 = vmul.f32 %v205_v32, %v572_v17  ;;  %v261_v32 = vld [vmem:[#allocation2 + $0x28] sm:$0xff] }
  0x63   :  { %v187_v13 = vadd.f32 %v186_v8, %v564_v10  ;;  %v234_v63 = vmul.f32 %v233_v59, %v552_v1  ;;  %v242_v8 = vmul.f32 %v233_v59, %v558_v5 }
  0x64   :  { %331 = vtanh.f32 %v119_v12 }
  0x65   :  { %333 = vtanh.f32 %v130_v18 }
  0x6e   :  { %v332_v22 = vpop.eup %331 }
  0x6f   :  { %v121_v24 = vmul.f32 0.5, %v332_v22  ;;  %v334_v30 = vpop.eup %333 }
  0x70   :  { %v132_v31 = vmul.f32 0.5, %v334_v30 }
  0x71   :  { %v122_v26 = vadd.f32 0.5, %v121_v24 }
  0x72   :  { %v133_v33 = vadd.f32 0.5, %v132_v31 }
  0x73   :  { %v142_v28 = vmul.f32 %v141_v25, %v122_v26 }
  0x75   :  { %v143_v29 = vadd.f32 %v142_v28, %v137_v27  ;;  %v195_v27 = vadd.f32 %v194_v21, %v578_v23  ;;  %v250_v21 = vmul.f32 %v233_v59, %v572_v17 }
  0x77   :  { %335 = vtanh.f32 %v143_v29 }
  0x81   :  { %v336_v34 = vpop.eup %335 }
  0x82   :  { %v145_v35 = vsub.f32 0.0, %v336_v34 }
  0x84   :  { %v146_v37 = vmul.f32 %v145_v35, %v133_v33 }
  0x86   :  { %v147_v38 = vadd.f32 %v336_v34, %v146_v37 }
  0x88   :  { %v152_v40 = vmul.f32 %v147_v38, %v554_v2  ;;  %v160_v45 = vmul.f32 %v147_v38, %v566_v11  ;;  %v168_v48 = vmul.f32 %v147_v38, %v570_v16 }
  0x8a   :  { %v153_v42 = vadd.f32 %v152_v40, %v151_v39  ;;  %v161_v46 = vadd.f32 %v160_v45, %v159_v44  ;;  %v169_v52 = vadd.f32 %v168_v48, %v575_v20  ;;  %v207_v39 = vadd.f32 %v206_v36, %v560_v6 }
  0x8b   :  { %v215_v44 = vadd.f32 %v214_v41, %v564_v10  ;;  %v262_v36 = vmul.f32 %v261_v32, %v552_v1  ;;  %v270_v41 = vmul.f32 %v261_v32, %v558_v5  ;;  %v278_v1 = vmul.f32 %v261_v32, %v572_v17 }
  0x8c   :  { %v154_v43 = vmul.f32 0.5, %v153_v42  ;;  %v162_v47 = vmul.f32 0.5, %v161_v46  ;;  %v289_v17 = vstv %s288_s1 }
  0x8d   :  { %v279_v5 = vadd.f32 %v278_v1, %v578_v23 }
  0x8e   :  { %337 = vtanh.f32 %v154_v43 }
  0x8f   :  { %339 = vtanh.f32 %v162_v47 }
  0x98   :  { %v338_v50 = vpop.eup %337 }
  0x99   :  { %v156_v51 = vmul.f32 0.5, %v338_v50  ;;  %v340_v57 = vpop.eup %339 }
  0x9a   :  { %v164_v58 = vmul.f32 0.5, %v340_v57 }
  0x9b   :  { %v157_v53 = vadd.f32 0.5, %v156_v51 }
  0x9c   :  { %v165_v60 = vadd.f32 0.5, %v164_v58 }
  0x9d   :  { %v170_v55 = vmul.f32 %v169_v52, %v157_v53 }
  0x9f   :  { %v171_v56 = vadd.f32 %v170_v55, %v167_v54  ;;  %v223_v54 = vadd.f32 %v222_v49, %v578_v23 }
  0xa1   :  { %341 = vtanh.f32 %v171_v56 }
  0xab   :  { %v342_v61 = vpop.eup %341 }
  0xac   :  { %v173_v62 = vsub.f32 %v147_v38, %v342_v61 }
  0xae   :  { %v174_v0 = vmul.f32 %v173_v62, %v165_v60 }
  0xb0   :  { %v175_v3 = vadd.f32 %v342_v61, %v174_v0 }
  0xb2   :  { %v180_v7 = vmul.f32 %v175_v3, %v554_v2  ;;  %v188_v14 = vmul.f32 %v175_v3, %v566_v11  ;;  %v196_v19 = vmul.f32 %v175_v3, %v570_v16 }
  0xb4   :  { %v181_v9 = vadd.f32 %v180_v7, %v179_v4  ;;  %v189_v15 = vadd.f32 %v188_v14, %v187_v13  ;;  %v197_v25 = vadd.f32 %v196_v19, %v575_v20  ;;  %v235_v4 = vadd.f32 %v234_v63, %v560_v6 }
  0xb5   :  { %v243_v13 = vadd.f32 %v242_v8, %v564_v10 }
  0xb6   :  { %v182_v12 = vmul.f32 0.5, %v181_v9  ;;  %v190_v18 = vmul.f32 0.5, %v189_v15 }
  0xb8   :  { %343 = vtanh.f32 %v182_v12 }
  0xb9   :  { %345 = vtanh.f32 %v190_v18 }
  0xc2   :  { %v344_v22 = vpop.eup %343 }
  0xc3   :  { %v184_v24 = vmul.f32 0.5, %v344_v22  ;;  %v346_v30 = vpop.eup %345 }
  0xc4   :  { %v192_v31 = vmul.f32 0.5, %v346_v30 }
  0xc5   :  { %v185_v26 = vadd.f32 0.5, %v184_v24 }
  0xc6   :  { %v193_v33 = vadd.f32 0.5, %v192_v31 }
  0xc7   :  { %v198_v28 = vmul.f32 %v197_v25, %v185_v26 }
  0xc9   :  { %v199_v29 = vadd.f32 %v198_v28, %v195_v27  ;;  %v251_v27 = vadd.f32 %v250_v21, %v578_v23 }
  0xcb   :  { %347 = vtanh.f32 %v199_v29 }
  0xd5   :  { %v348_v34 = vpop.eup %347 }
  0xd6   :  { %v201_v35 = vsub.f32 %v175_v3, %v348_v34 }
  0xd8   :  { %v202_v37 = vmul.f32 %v201_v35, %v193_v33 }
  0xda   :  { %v203_v38 = vadd.f32 %v348_v34, %v202_v37 }
  0xdc   :  { %v208_v40 = vmul.f32 %v203_v38, %v554_v2  ;;  %v216_v45 = vmul.f32 %v203_v38, %v566_v11  ;;  %v224_v48 = vmul.f32 %v203_v38, %v570_v16 }
  0xde   :  { %v209_v42 = vadd.f32 %v208_v40, %v207_v39  ;;  %v217_v46 = vadd.f32 %v216_v45, %v215_v44  ;;  %v225_v52 = vadd.f32 %v224_v48, %v575_v20  ;;  %v263_v39 = vadd.f32 %v262_v36, %v560_v6 }
  0xdf   :  { %v271_v44 = vadd.f32 %v270_v41, %v564_v10 }
  0xe0   :  { %v210_v43 = vmul.f32 0.5, %v209_v42  ;;  %v218_v47 = vmul.f32 0.5, %v217_v46 }
  0xe2   :  { %349 = vtanh.f32 %v210_v43 }
  0xe3   :  { %351 = vtanh.f32 %v218_v47 }
  0xec   :  { %v350_v50 = vpop.eup %349 }
  0xed   :  { %v212_v51 = vmul.f32 0.5, %v350_v50  ;;  %v352_v57 = vpop.eup %351 }
  0xee   :  { %v220_v58 = vmul.f32 0.5, %v352_v57  ;;  %v292_v57 = vstv %s321_s18 }
  0xef   :  { %v213_v53 = vadd.f32 0.5, %v212_v51 }
  0xf0   :  { %v221_v60 = vadd.f32 0.5, %v220_v58 }
  0xf1   :  { %v226_v55 = vmul.f32 %v225_v52, %v213_v53 }
  0xf3   :  { %v227_v56 = vadd.f32 %v226_v55, %v223_v54 }
  0xf5   :  { %353 = vtanh.f32 %v227_v56 }
  0xff   :  { %v354_v61 = vpop.eup %353 }
 0x100   :  { %v229_v62 = vsub.f32 %v203_v38, %v354_v61 }
 0x102   :  { %v230_v0 = vmul.f32 %v229_v62, %v221_v60 }
 0x104   :  { %v231_v3 = vadd.f32 %v354_v61, %v230_v0 }
 0x106   :  { %v236_v7 = vmul.f32 %v231_v3, %v554_v2  ;;  %v244_v14 = vmul.f32 %v231_v3, %v566_v11  ;;  %v252_v19 = vmul.f32 %v231_v3, %v570_v16 }
 0x108   :  { %v237_v9 = vadd.f32 %v236_v7, %v235_v4  ;;  %v245_v15 = vadd.f32 %v244_v14, %v243_v13  ;;  %v253_v25 = vadd.f32 %v252_v19, %v575_v20 }
 0x10a   :  { %v238_v12 = vmul.f32 0.5, %v237_v9  ;;  %v246_v18 = vmul.f32 0.5, %v245_v15 }
 0x10c   :  { %355 = vtanh.f32 %v238_v12 }
 0x10d   :  { %357 = vtanh.f32 %v246_v18 }
 0x116   :  { %v356_v22 = vpop.eup %355 }
 0x117   :  { %v240_v24 = vmul.f32 0.5, %v356_v22  ;;  %v358_v30 = vpop.eup %357 }
 0x118   :  { %v248_v31 = vmul.f32 0.5, %v358_v30 }
 0x119   :  { %v241_v26 = vadd.f32 0.5, %v240_v24 }
 0x11a   :  { %v249_v33 = vadd.f32 0.5, %v248_v31 }
 0x11b   :  { %v254_v28 = vmul.f32 %v253_v25, %v241_v26 }
 0x11d   :  { %v255_v29 = vadd.f32 %v254_v28, %v251_v27 }
 0x11f   :  { %359 = vtanh.f32 %v255_v29 }
 0x129   :  { %v360_v34 = vpop.eup %359 }
 0x12a   :  { %v257_v35 = vsub.f32 %v231_v3, %v360_v34 }
 0x12c   :  { %v258_v37 = vmul.f32 %v257_v35, %v249_v33 }
 0x12e   :  { %v259_v38 = vadd.f32 %v360_v34, %v258_v37 }
 0x130   :  { %v264_v40 = vmul.f32 %v259_v38, %v554_v2  ;;  %v272_v45 = vmul.f32 %v259_v38, %v566_v11  ;;  %v280_v48 = vmul.f32 %v259_v38, %v570_v16 }
 0x132   :  { %v265_v42 = vadd.f32 %v264_v40, %v263_v39  ;;  %v273_v46 = vadd.f32 %v272_v45, %v271_v44  ;;  %v281_v2 = vadd.f32 %v280_v48, %v575_v20 }
 0x134   :  { %v266_v43 = vmul.f32 0.5, %v265_v42  ;;  %v274_v47 = vmul.f32 0.5, %v273_v46 }
 0x136   :  { %361 = vtanh.f32 %v266_v43 }
 0x137   :  { %363 = vtanh.f32 %v274_v47 }
 0x140   :  { %v362_v49 = vpop.eup %361 }
 0x141   :  { %v268_v50 = vmul.f32 0.5, %v362_v49  ;;  %v364_v10 = vpop.eup %363 }
 0x142   :  { %v276_v11 = vmul.f32 0.5, %v364_v10 }
 0x143   :  { %v269_v6 = vadd.f32 0.5, %v268_v50 }
 0x144   :  { %v277_v53 = vadd.f32 0.5, %v276_v11 }
 0x145   :  { %v282_v51 = vmul.f32 %v281_v2, %v269_v6 }
 0x147   :  { %v283_v52 = vadd.f32 %v282_v51, %v279_v5 }
 0x149   :  { %365 = vtanh.f32 %v283_v52 }
 0x153   :  { %v366_v54 = vpop.eup %365 }
 0x154   :  { %v285_v16 = vsub.f32 %v259_v38, %v366_v54 }
 0x156   :  { %v286_v55 = vmul.f32 %v285_v16, %v277_v53 }
 0x158   :  { %v287_v56 = vadd.f32 %v366_v54, %v286_v55 }
 0x15a   :  { %v290_v20 = vmul.f32 %v289_v17, %v287_v56 }
 0x15c   :  { %v293_v58 = vadd.f32 %v292_v57, %v290_v20 }
 0x15e   :  { %294 = vst [vmem:[#allocation13] sm:$0xff] %v293_v58 }
 0x15f   :  { %460 = shalt.err (!%p457_p9)
}
 0x160   :  { %s461_s24 = scalar_lea.hbm %s650_s6, 128 }
 0x161   :  { %p462_p10 = scmp.ne.s32.totalorder %s650_s6, %s461_s24  ;;  %p465_p11 = scmp.lt.u32.totalorder %s461_s24, %s650_s6 }
 0x163   :  { %p467_p12 = pnand %p465_p11, %p462_p10 }
 0x165   :  { %470 = shalt.err (!%p467_p12)
}
 0x166   :  { %304 = dma.vmem_to_hbm [thread:$0]  %s302_s20, 128, %s650_s6, [#allocation4]  }
 0x167   :  { %479 = dma.done.wait [#allocation4], 128  }
 0x168   :  { %480 = vsyncadd [#allocation4], 4294967168 }
 0x169   :  { %308 = vsyncpa [#allocation3], 1 }
 0x16a   :  { %309 = vsyncpa [#allocation4], 1 }
 0x16b   :  { %310 = vsyncpa [#allocation5], 1 }
 0x16c   :  { %311 = vsyncpa [#allocation8], 1 }
 0x16d   :  { %312 = vsyncpa [#allocation11], 1 }

</bundles_post_ra>
